<compile_context>
chip_gen: v5e
topology: v5e:2x2
jax: 0.10.0
libtpu: 0.0.40
codegen_flags: <defaults>
</compile_context>

<pallas_src>
import jax
import jax.numpy as jnp
from jax.experimental import pallas as pl
from jax.experimental.pallas import tpu as pltpu

HIDDEN = 256
_SUBLANE = 16  # bf16 sublane packing


def _actor_kernel(ma_ref, x_ref, w1_ref, b1_ref, w2_ref, b2_ref,
                  w3_ref, b3_ref, o_ref):
    # x: (TB, state_dim) bf16; w*: bf16; b*: f32; o: (TB, action_dim) f32.
    x = x_ref[...]

    # l1 + relu (bf16 MXU inputs, f32 accumulate, f32 elementwise)
    h = jnp.dot(x, w1_ref[...], preferred_element_type=jnp.float32) + b1_ref[...]
    h = jnp.maximum(h, 0.0)

    # l2 + relu
    h = jnp.dot(h.astype(jnp.bfloat16), w2_ref[...],
                preferred_element_type=jnp.float32) + b2_ref[...]
    h = jnp.maximum(h, 0.0)

    # l3 + tanh, scaled by max_action (SMEM scalar)
    a = jnp.dot(h.astype(jnp.bfloat16), w3_ref[...],
                preferred_element_type=jnp.float32) + b3_ref[...]
    o_ref[...] = ma_ref[0, 0] * jnp.tanh(a)


def _round_up(x, m):
    return ((x + m - 1) // m) * m


def _max_batch_tile():
    # v6e / v7x: big tiles amortize the ~0.35us per-step overhead and easily
    # fit VMEM. v5e: keep tiles modest (single vst slot, 820 GB/s HBM).
    try:
        info = pltpu.get_tpu_info()
        ver = str(getattr(info, "chip_version", getattr(info, "version", "")))
        if "5" in ver:
            return 512
    except Exception:
        pass
    return 1024


def _select_batch_tile(B):
    if B <= _SUBLANE:
        return B  # single block whose dims equal the full array dims
    # At least two grid steps (keeps both v7x TensorCores busy), rounded up
    # to a bf16 sublane-packing multiple, capped per generation.
    tb = _round_up(pl.cdiv(B, 2), _SUBLANE)
    return min(tb, _max_batch_tile())


def actor_forward(state, params, max_action):
    """Pallas implementation of Actor.forward.

    state: (B, state_dim) float32 (or bfloat16)
    params: dict with w1 (state_dim,256), b1 (1,256), w2 (256,256), b2 (1,256),
            w3 (256,action_dim), b3 (1,action_dim)
    returns: (B, action_dim) float32
    """
    B, state_dim = state.shape
    action_dim = params["w3"].shape[1]

    TB = _select_batch_tile(B)
    grid = (pl.cdiv(B, TB),)

    # bf16 MXU inputs. astype is a no-op if params were already prepared.
    x = state.astype(jnp.bfloat16)
    w1 = params["w1"].astype(jnp.bfloat16)
    w2 = params["w2"].astype(jnp.bfloat16)
    w3 = params["w3"].astype(jnp.bfloat16)
    b1 = params["b1"].astype(jnp.float32).reshape(1, HIDDEN)
    b2 = params["b2"].astype(jnp.float32).reshape(1, HIDDEN)
    b3 = params["b3"].astype(jnp.float32).reshape(1, action_dim)

    # max_action as an SMEM scalar -> no recompile per distinct value.
    ma = jnp.asarray(max_action, jnp.float32).reshape(1, 1)

    flops = 2 * B * (state_dim * HIDDEN + HIDDEN * HIDDEN + HIDDEN * action_dim)
    bytes_accessed = (B * state_dim * 2 + B * action_dim * 4
                      + (state_dim * HIDDEN + HIDDEN * HIDDEN
                         + HIDDEN * action_dim) * 2
                      + (2 * HIDDEN + action_dim) * 4)

    return pl.pallas_call(
        _actor_kernel,
        out_shape=jax.ShapeDtypeStruct((B, action_dim), jnp.float32),
        grid=grid,
        in_specs=[
            pl.BlockSpec(memory_space=pltpu.MemorySpace.SMEM),      # max_action
            pl.BlockSpec((TB, state_dim), lambda i: (i, 0)),        # x tile (pipelined)
            pl.BlockSpec((state_dim, HIDDEN), lambda i: (0, 0)),    # w1 (resident)
            pl.BlockSpec((1, HIDDEN), lambda i: (0, 0)),            # b1
            pl.BlockSpec((HIDDEN, HIDDEN), lambda i: (0, 0)),       # w2
            pl.BlockSpec((1, HIDDEN), lambda i: (0, 0)),            # b2
            pl.BlockSpec((HIDDEN, action_dim), lambda i: (0, 0)),   # w3
            pl.BlockSpec((1, action_dim), lambda i: (0, 0)),        # b3
        ],
        out_specs=pl.BlockSpec((TB, action_dim), lambda i: (i, 0)),
        compiler_params=pltpu.CompilerParams(
            dimension_semantics=("parallel",)),
        cost_estimate=pl.CostEstimate(
            flops=flops,
            transcendentals=B * action_dim,
            bytes_accessed=bytes_accessed),
    )(ma, x, w1, b1, w2, b2, w3, b3)


def prepare_params(params):
    """One-time cast: weights -> bf16 (MXU), biases -> f32 (avoids per-call casts)."""
    return {
        "w1": params["w1"].astype(jnp.bfloat16),
        "w2": params["w2"].astype(jnp.bfloat16),
        "w3": params["w3"].astype(jnp.bfloat16),
        "b1": params["b1"].astype(jnp.float32),
        "b2": params["b2"].astype(jnp.float32),
        "b3": params["b3"].astype(jnp.float32),
    }


def init_params(key, state_dim, action_dim):
    """Deterministic init mirroring nn.Linear's U(-1/sqrt(fan_in), 1/sqrt(fan_in))."""
    ks = jax.random.split(key, 6)

    def lin(kw, kb, fan_in, fan_out):
        bound = 1.0 / jnp.sqrt(jnp.float32(fan_in))
        w = jax.random.uniform(kw, (fan_in, fan_out), jnp.float32, -bound, bound)
        b = jax.random.uniform(kb, (1, fan_out), jnp.float32, -bound, bound)
        return w, b

    w1, b1 = lin(ks[0], ks[1], state_dim, HIDDEN)
    w2, b2 = lin(ks[2], ks[3], HIDDEN, HIDDEN)
    w3, b3 = lin(ks[4], ks[5], HIDDEN, action_dim)
    return {"w1": w1, "b1": b1, "w2": w2, "b2": b2, "w3": w3, "b3": b3}


def actor_reference(state, params, max_action):
    """Pure-JAX reference using the same bf16-input / f32-accumulate arithmetic."""
    w1 = params["w1"].astype(jnp.bfloat16)
    w2 = params["w2"].astype(jnp.bfloat16)
    w3 = params["w3"].astype(jnp.bfloat16)
    h = jnp.dot(state.astype(jnp.bfloat16), w1,
                preferred_element_type=jnp.float32) + params["b1"].astype(jnp.float32)
    h = jnp.maximum(h, 0.0)
    h = jnp.dot(h.astype(jnp.bfloat16), w2,
                preferred_element_type=jnp.float32) + params["b2"].astype(jnp.float32)
    h = jnp.maximum(h, 0.0)
    a = jnp.dot(h.astype(jnp.bfloat16), w3,
                preferred_element_type=jnp.float32) + params["b3"].astype(jnp.float32)
    return jnp.float32(max_action) * jnp.tanh(a)


def actor_reference_f32(state, params, max_action):
    """Pure-f32 reference matching the original PyTorch module's arithmetic."""
    h = jnp.maximum(state @ params["w1"] + params["b1"], 0.0)
    h = jnp.maximum(h @ params["w2"] + params["b2"], 0.0)
    return max_action * jnp.tanh(h @ params["w3"] + params["b3"])


if __name__ == "__main__":
    key = jax.random.PRNGKey(0)
    k_params, k_state, k_state2 = jax.random.split(key, 3)

    state_dim = 16
    action_dim = 8
    max_action = 1.5
    raw_params = init_params(k_params, state_dim, action_dim)
    params = prepare_params(raw_params)  # one-time bf16 weight cast

    # Small batch (single block whose dims equal the full array dims).
    batch = 2
    state = jax.random.normal(k_state, (batch, state_dim), dtype=jnp.float32)
    out = jax.block_until_ready(actor_forward(state, params, max_action))
    assert out.shape == (batch, action_dim)
    ref = actor_reference(state, raw_params, max_action)
    assert jnp.allclose(out, ref, atol=2e-3, rtol=2e-3)
    ref32 = actor_reference_f32(state, raw_params, max_action)
    assert jnp.allclose(out, ref32, atol=5e-2, rtol=5e-2)

    # Batch exercising the multi-step grid and a ragged (masked) last block.
    batch2 = 520
    state2 = jax.random.normal(k_state2, (batch2, state_dim), dtype=jnp.float32)
    out2 = jax.block_until_ready(actor_forward(state2, params, max_action))
    assert out2.shape == (batch2, action_dim)
    ref2 = actor_reference(state2, raw_params, max_action)
    assert jnp.allclose(out2, ref2, atol=2e-3, rtol=2e-3)

    print("KERNEL_OK")
</pallas_src>

<mosaic_0001>
module attributes {stable_mosaic.version = 11 : i64} {
  func.func @_actor_kernel(%arg0: i32, %arg1: memref<1x1xf32, #tpu.memory_space<smem>>, %arg2: memref<2x16xbf16, #tpu.memory_space<vmem>>, %arg3: memref<16x256xbf16, #tpu.memory_space<vmem>>, %arg4: memref<1x256xf32, #tpu.memory_space<vmem>>, %arg5: memref<256x256xbf16, #tpu.memory_space<vmem>>, %arg6: memref<1x256xf32, #tpu.memory_space<vmem>>, %arg7: memref<256x8xbf16, #tpu.memory_space<vmem>>, %arg8: memref<1x8xf32, #tpu.memory_space<vmem>>, %arg9: memref<2x8xf32, #tpu.memory_space<vmem>>) attributes {dimension_semantics = [#tpu.dimension_semantics<parallel>], iteration_bounds = array<i64: 1>, scalar_prefetch = 0 : i64, scratch_operands = 0 : i64, tpu.core_type = #tpu.core_type<tc>, window_params = [{transform_indices = @transform_0, window_bounds = array<i64: 1, 1>}, {transform_indices = @transform_1, window_bounds = array<i64: 2, 16>}, {pipeline_mode = #tpu.pipeline_mode<synchronous>, transform_indices = @transform_2, window_bounds = array<i64: 16, 256>}, {pipeline_mode = #tpu.pipeline_mode<synchronous>, transform_indices = @transform_3, window_bounds = array<i64: 1, 256>}, {pipeline_mode = #tpu.pipeline_mode<synchronous>, transform_indices = @transform_4, window_bounds = array<i64: 256, 256>}, {pipeline_mode = #tpu.pipeline_mode<synchronous>, transform_indices = @transform_5, window_bounds = array<i64: 1, 256>}, {pipeline_mode = #tpu.pipeline_mode<synchronous>, transform_indices = @transform_6, window_bounds = array<i64: 256, 8>}, {pipeline_mode = #tpu.pipeline_mode<synchronous>, transform_indices = @transform_7, window_bounds = array<i64: 1, 8>}, {transform_indices = @transform_8, window_bounds = array<i64: 2, 8>}]} {
    %c0 = arith.constant 0 : index
    %c0_0 = arith.constant 0 : index
    %0 = vector.load %arg2[%c0, %c0_0] : memref<2x16xbf16, #tpu.memory_space<vmem>>, vector<2x16xbf16>
    %c0_1 = arith.constant 0 : index
    %c0_2 = arith.constant 0 : index
    %1 = vector.load %arg3[%c0_1, %c0_2] : memref<16x256xbf16, #tpu.memory_space<vmem>>, vector<16x256xbf16>
    %cst = arith.constant dense<0.000000e+00> : vector<2x256xf32>
    %2 = tpu.matmul %0, %1, %cst {dimension_numbers = #tpu.dot_dimension_numbers<[1], [0], [0], [1], [0, 0, 1, 1], [], []>} : vector<2x16xbf16>, vector<16x256xbf16>, vector<2x256xf32> -> vector<2x256xf32>
    %c0_3 = arith.constant 0 : index
    %c0_4 = arith.constant 0 : index
    %3 = vector.load %arg4[%c0_3, %c0_4] : memref<1x256xf32, #tpu.memory_space<vmem>>, vector<1x256xf32>
    %4 = vector.broadcast %3 : vector<1x256xf32> to vector<2x256xf32>
    %5 = arith.addf %2, %4 : vector<2x256xf32>
    %cst_5 = arith.constant 0.000000e+00 : f32
    %6 = vector.broadcast %cst_5 : f32 to vector<2x256xf32>
    %7 = arith.maximumf %5, %6 : vector<2x256xf32>
    %8 = arith.truncf %7 : vector<2x256xf32> to vector<2x256xbf16>
    %c0_6 = arith.constant 0 : index
    %c0_7 = arith.constant 0 : index
    %9 = vector.load %arg5[%c0_6, %c0_7] : memref<256x256xbf16, #tpu.memory_space<vmem>>, vector<256x256xbf16>
    %cst_8 = arith.constant dense<0.000000e+00> : vector<2x256xf32>
    %10 = tpu.matmul %8, %9, %cst_8 {dimension_numbers = #tpu.dot_dimension_numbers<[1], [0], [0], [1], [0, 0, 1, 1], [], []>} : vector<2x256xbf16>, vector<256x256xbf16>, vector<2x256xf32> -> vector<2x256xf32>
    %c0_9 = arith.constant 0 : index
    %c0_10 = arith.constant 0 : index
    %11 = vector.load %arg6[%c0_9, %c0_10] : memref<1x256xf32, #tpu.memory_space<vmem>>, vector<1x256xf32>
    %12 = vector.broadcast %11 : vector<1x256xf32> to vector<2x256xf32>
    %13 = arith.addf %10, %12 : vector<2x256xf32>
    %cst_11 = arith.constant 0.000000e+00 : f32
    %14 = vector.broadcast %cst_11 : f32 to vector<2x256xf32>
    %15 = arith.maximumf %13, %14 : vector<2x256xf32>
    %16 = arith.truncf %15 : vector<2x256xf32> to vector<2x256xbf16>
    %c0_12 = arith.constant 0 : index
    %c0_13 = arith.constant 0 : index
    %17 = vector.load %arg7[%c0_12, %c0_13] : memref<256x8xbf16, #tpu.memory_space<vmem>>, vector<256x8xbf16>
    %cst_14 = arith.constant dense<0.000000e+00> : vector<2x8xf32>
    %18 = tpu.matmul %16, %17, %cst_14 {dimension_numbers = #tpu.dot_dimension_numbers<[1], [0], [0], [1], [0, 0, 1, 1], [], []>} : vector<2x256xbf16>, vector<256x8xbf16>, vector<2x8xf32> -> vector<2x8xf32>
    %c0_15 = arith.constant 0 : index
    %c0_16 = arith.constant 0 : index
    %19 = vector.load %arg8[%c0_15, %c0_16] : memref<1x8xf32, #tpu.memory_space<vmem>>, vector<1x8xf32>
    %20 = vector.broadcast %19 : vector<1x8xf32> to vector<2x8xf32>
    %21 = arith.addf %18, %20 : vector<2x8xf32>
    %c0_17 = arith.constant 0 : index
    %c0_18 = arith.constant 0 : index
    %22 = memref.load %arg1[%c0_17, %c0_18] : memref<1x1xf32, #tpu.memory_space<smem>>
    %23 = math.tanh %21 : vector<2x8xf32>
    %24 = vector.broadcast %22 : f32 to vector<2x8xf32>
    %25 = arith.mulf %24, %23 : vector<2x8xf32>
    %c0_19 = arith.constant 0 : index
    %c0_20 = arith.constant 0 : index
    %26 = vector.load %arg9[%c0_19, %c0_20] : memref<2x8xf32, #tpu.memory_space<vmem>>, vector<2x8xf32>
    tpu.vector_store %arg9[%c0_19, %c0_20], %25 {strides = array<i32>} : memref<2x8xf32, #tpu.memory_space<vmem>>, vector<2x8xf32>,
    return
  }
  func.func @transform_0(%arg0: i32) -> (i32, i32) {
    %c0_i32 = arith.constant 0 : i32
    %c0_i32_0 = arith.constant 0 : i32
    %c0_i32_1 = arith.constant 0 : i32
    return %c0_i32, %c0_i32_0 : i32, i32
  }
  func.func @transform_1(%arg0: i32) -> (i32, i32) {
    %c0_i32 = arith.constant 0 : i32
    %c0_i32_0 = arith.constant 0 : i32
    return %arg0, %c0_i32 : i32, i32
  }
  func.func @transform_2(%arg0: i32) -> (i32, i32) {
    %c0_i32 = arith.constant 0 : i32
    %c0_i32_0 = arith.constant 0 : i32
    %c0_i32_1 = arith.constant 0 : i32
    return %c0_i32, %c0_i32_0 : i32, i32
  }
  func.func @transform_3(%arg0: i32) -> (i32, i32) {
    %c0_i32 = arith.constant 0 : i32
    %c0_i32_0 = arith.constant 0 : i32
    %c0_i32_1 = arith.constant 0 : i32
    return %c0_i32, %c0_i32_0 : i32, i32
  }
  func.func @transform_4(%arg0: i32) -> (i32, i32) {
    %c0_i32 = arith.constant 0 : i32
    %c0_i32_0 = arith.constant 0 : i32
    %c0_i32_1 = arith.constant 0 : i32
    return %c0_i32, %c0_i32_0 : i32, i32
  }
  func.func @transform_5(%arg0: i32) -> (i32, i32) {
    %c0_i32 = arith.constant 0 : i32
    %c0_i32_0 = arith.constant 0 : i32
    %c0_i32_1 = arith.constant 0 : i32
    return %c0_i32, %c0_i32_0 : i32, i32
  }
  func.func @transform_6(%arg0: i32) -> (i32, i32) {
    %c0_i32 = arith.constant 0 : i32
    %c0_i32_0 = arith.constant 0 : i32
    %c0_i32_1 = arith.constant 0 : i32
    return %c0_i32, %c0_i32_0 : i32, i32
  }
  func.func @transform_7(%arg0: i32) -> (i32, i32) {
    %c0_i32 = arith.constant 0 : i32
    %c0_i32_0 = arith.constant 0 : i32
    %c0_i32_1 = arith.constant 0 : i32
    return %c0_i32, %c0_i32_0 : i32, i32
  }
  func.func @transform_8(%arg0: i32) -> (i32, i32) {
    %c0_i32 = arith.constant 0 : i32
    %c0_i32_0 = arith.constant 0 : i32
    return %arg0, %c0_i32 : i32, i32
  }
}

</mosaic_0001>

<bundles_post_ra>
// kernel: tpu_custom_call.1
= control target key start
LH: loop header
LB: loop body
LE: loop exit
PB: predicated region body
PF: predicated region fallthrough
CT: control target
= control target key end

     0   :  { %14 = vsyncpa [#allocation4], 0  ;;  %s979_s0 = inlined_call_operand.<no memory space> [shape: f32[1,1], index: 0, kind: input, shape index: {}]   ;;  %s980_s1 = inlined_call_operand.vmem [shape: bf16[2,16], index: 1, kind: input, shape index: {}]   ;;  %s981_s2 = inlined_call_operand.vmem [shape: bf16[16,256], index: 2, kind: input, shape index: {}]   ;;  %s982_s3 = inlined_call_operand.vmem [shape: f32[1,256], index: 3, kind: input, shape index: {}]   ;;  %s983_s4 = inlined_call_operand.hbm [shape: bf16[256,256], index: 4, kind: input, shape index: {}]   ;;  %s984_s5 = inlined_call_operand.vmem [shape: f32[1,256], index: 5, kind: input, shape index: {}]   ;;  %s985_s6 = inlined_call_operand.vmem [shape: bf16[256,8], index: 6, kind: input, shape index: {}]   ;;  %s986_s7 = inlined_call_operand.vmem [shape: f32[1,8], index: 7, kind: input, shape index: {}]   ;;  %s987_s8 = inlined_call_operand.hbm [shape: f32[2,8], index: 8, kind: output, shape index: {}]  }
   0x1   :  { %15 = vsyncpa [#allocation5], 0  ;;  %s28_s29 = sshll.u32 %s983_s4, 4  ;;  %s847_s30 = smov [#allocation3]   ;;  %s29_s29 = int_to_ptr.hbm [resolvable:$true] %s28_s29 }
   0x2   :  { %s30_s9 = sshll.u32 %s847_s30, 4  ;;  %s848_s10 = smov 128   ;;  %s31_s9 = int_to_ptr.vmem [resolvable:$true] %s30_s9 }
   0x3   :  { %s849_s11 = smov 8  }
   0x4   :  { %36 = dma.hbm_to_vmem [thread:$0]  %s29_s29, 4096, %s31_s9, [#allocation4], %s848_s10, %s848_s10, %s849_s11  }
   0x5   :  { %843 = dma.done.wait [#allocation4], 4096  }
   0x6   :  { %844 = vsyncadd [#allocation4], 4294963200  ;;  %vm67_vm0 = vcmask 130048   ;;  %v538_v0 = vld [vmem:[%s981_s2] sm:$0xf]  ;;  %s850_s9 = smov [#allocation6]  }
   0x7   :  { %v739_v1 = vld [vmem:[%s981_s2 + $0x4] sm:$0xf0]  ;;  %v738_v2 = vld [vmem:[%s981_s2 + $0x4] sm:$0xf]  ;;  %v540_v4 = vld [vmem:[%s981_s2 + $0x8] sm:$0xf0] }
   0x8   :  { %v539_v3 = vor.u32 %v739_v1, %v538_v0  ;;  %v48_v5 = vld [vmem:[%s980_s1] sm:$0x1]  ;;  %v604_v6 = vld [vmem:[#allocation3 + $0x70] sm:$0xf]  ;;  %v543_v7 = vor.u32 %v738_v2, %v540_v4  ;;  %v755_v8 = vld [vmem:[#allocation3 + $0x74] sm:$0xf0] }
   0x9   :  { %v668_v9 = vld [vmem:[#allocation3 + $0xf0] sm:$0xf]  ;;  %v771_v10 = vld [vmem:[#allocation3 + $0xf4] sm:$0xf0]  ;;  %v605_v11 = vor.u32 %v755_v8, %v604_v6  ;;  %v754_v13 = vld [vmem:[#allocation3 + $0x74] sm:$0xf] }
   0xa   :  { %78 = vmatpush.bf16.msra.mxu0 %v539_v3  ;;  %v669_v12 = vor.u32 %v771_v10, %v668_v9  ;;  %v606_v14 = vld [vmem:[#allocation3 + $0x78] sm:$0xf0]  ;;  %v770_v15 = vld [vmem:[#allocation3 + $0xf4] sm:$0xf]  ;;  %91 = vmatpush.bf16.msra.mxu1 %v543_v7  ;;  %v596_v18 = vld [vmem:[#allocation3 + $0x60] sm:$0xf] }
   0xb   :  { %v609_v16 = vor.u32 %v754_v13, %v606_v14  ;;  %v670_v17 = vld [vmem:[#allocation3 + $0xf8] sm:$0xf0]  ;;  %v753_v19 = vld [vmem:[#allocation3 + $0x64] sm:$0xf0]  ;;  %299 = vmatpush.bf16.msra.mxu2 %v605_v11  ;;  %v660_v22 = vld [vmem:[#allocation3 + $0xe0] sm:$0xf] }
   0xc   :  { %312 = vmatpush.bf16.msra.mxu3 %v669_v12  ;;  %v673_v20 = vor.u32 %v770_v15, %v670_v17  ;;  %v597_v21 = vor.u32 %v753_v19, %v596_v18  ;;  %v769_v23 = vld [vmem:[#allocation3 + $0xe4] sm:$0xf0]  ;;  %v752_v24 = vld [vmem:[#allocation3 + $0x64] sm:$0xf]  ;;  %v598_v26 = vld [vmem:[#allocation3 + $0x68] sm:$0xf0] }
   0xd   :  { %544 = vmatmul.msk.bf16.vlgmr.msra.gmra.mxu0 %vm67_vm0, %v48_v5  ;;  %v661_v25 = vor.u32 %v769_v23, %v660_v22  ;;  %v768_v27 = vld [vmem:[#allocation3 + $0xe4] sm:$0xf]  ;;  %v662_v28 = vld [vmem:[#allocation3 + $0xe8] sm:$0xf0]  ;;  %545 = vmatmul.msk.bf16.vlgmr.msra.gmra.mxu1 %vm67_vm0, %v48_v5  ;;  %v601_v29 = vor.u32 %v752_v24, %v598_v26  ;;  %v588_v30 = vld [vmem:[#allocation3 + $0x50] sm:$0xf] }
   0xe   :  { %325 = vmatpush.bf16.msrb.mxu0 %v609_v16  ;;  %v751_v31 = vld [vmem:[#allocation3 + $0x54] sm:$0xf0]  ;;  %v652_v32 = vld [vmem:[#allocation3 + $0xd0] sm:$0xf]  ;;  %338 = vmatpush.bf16.msrb.mxu1 %v673_v20  ;;  %v665_v33 = vor.u32 %v768_v27, %v662_v28  ;;  %v750_v35 = vld [vmem:[#allocation3 + $0x54] sm:$0xf] }
   0xf   :  { %v767_v34 = vld [vmem:[#allocation3 + $0xd4] sm:$0xf0]  ;;  %v590_v36 = vld [vmem:[#allocation3 + $0x58] sm:$0xf0]  ;;  %300 = vmatpush.bf16.msra.mxu2 %v597_v21  ;;  %v589_v37 = vor.u32 %v751_v31, %v588_v30  ;;  %v766_v39 = vld [vmem:[#allocation3 + $0xd4] sm:$0xf] }
  0x10   :  { %313 = vmatpush.bf16.msra.mxu3 %v661_v25  ;;  %v653_v38 = vor.u32 %v767_v34, %v652_v32  ;;  %v654_v40 = vld [vmem:[#allocation3 + $0xd8] sm:$0xf0]  ;;  %v580_v41 = vld [vmem:[#allocation3 + $0x40] sm:$0xf]  ;;  %v749_v42 = vld [vmem:[#allocation3 + $0x44] sm:$0xf0]  ;;  %v593_v45 = vor.u32 %v750_v35, %v590_v36 }
  0x11   :  { %v644_v43 = vld [vmem:[#allocation3 + $0xc0] sm:$0xf]  ;;  %v765_v44 = vld [vmem:[#allocation3 + $0xc4] sm:$0xf0]  ;;  %v657_v46 = vor.u32 %v766_v39, %v654_v40  ;;  %v748_v47 = vld [vmem:[#allocation3 + $0x44] sm:$0xf]  ;;  %v581_v49 = vor.u32 %v749_v42, %v580_v41 }
  0x12   :  { %326 = vmatpush.bf16.msrb.mxu0 %v601_v29  ;;  %339 = vmatpush.bf16.msrb.mxu1 %v665_v33  ;;  %v582_v48 = vld [vmem:[#allocation3 + $0x48] sm:$0xf0]  ;;  %v645_v50 = vor.u32 %v765_v44, %v644_v43  ;;  %v764_v51 = vld [vmem:[#allocation3 + $0xc4] sm:$0xf]  ;;  %v572_v53 = vld [vmem:[#allocation3 + $0x30] sm:$0xf] }
  0x13   :  { %301 = vmatpush.bf16.msra.mxu2 %v589_v37  ;;  %v646_v52 = vld [vmem:[#allocation3 + $0xc8] sm:$0xf0]  ;;  %v747_v54 = vld [vmem:[#allocation3 + $0x34] sm:$0xf0]  ;;  %v636_v55 = vld [vmem:[#allocation3 + $0xb0] sm:$0xf]  ;;  %v585_v57 = vor.u32 %v748_v47, %v582_v48 }
  0x14   :  { %314 = vmatpush.bf16.msra.mxu3 %v653_v38  ;;  %v763_v56 = vld [vmem:[#allocation3 + $0xb4] sm:$0xf0]  ;;  %v649_v58 = vor.u32 %v764_v51, %v646_v52  ;;  %v746_v59 = vld [vmem:[#allocation3 + $0x34] sm:$0xf]  ;;  %v574_v60 = vld [vmem:[#allocation3 + $0x38] sm:$0xf0]  ;;  %v573_v62 = vor.u32 %v747_v54, %v572_v53 }
  0x15   :  { %v762_v61 = vld [vmem:[#allocation3 + $0xb4] sm:$0xf]  ;;  %v637_v63 = vor.u32 %v763_v56, %v636_v55  ;;  %v638_v0 = vld [vmem:[#allocation3 + $0xb8] sm:$0xf0]  ;;  %v564_v1 = vld [vmem:[#allocation3 + $0x20] sm:$0xf]  ;;  %v577_v5 = vor.u32 %v746_v59, %v574_v60 }
  0x16   :  { %327 = vmatpush.bf16.msrb.mxu0 %v593_v45  ;;  %340 = vmatpush.bf16.msrb.mxu1 %v657_v46  ;;  %v745_v2 = vld [vmem:[#allocation3 + $0x24] sm:$0xf0]  ;;  %v628_v3 = vld [vmem:[#allocation3 + $0xa0] sm:$0xf]  ;;  %v641_v6 = vor.u32 %v762_v61, %v638_v0  ;;  %v744_v7 = vld [vmem:[#allocation3 + $0x24] sm:$0xf] }
  0x17   :  { %302 = vmatpush.bf16.msra.mxu2 %v581_v49  ;;  %v761_v4 = vld [vmem:[#allocation3 + $0xa4] sm:$0xf0]  ;;  %v566_v8 = vld [vmem:[#allocation3 + $0x28] sm:$0xf0]  ;;  %v565_v9 = vor.u32 %v745_v2, %v564_v1  ;;  %v760_v11 = vld [vmem:[#allocation3 + $0xa4] sm:$0xf] }
  0x18   :  { %315 = vmatpush.bf16.msra.mxu3 %v645_v50  ;;  %v629_v10 = vor.u32 %v761_v4, %v628_v3  ;;  %v630_v12 = vld [vmem:[#allocation3 + $0xa8] sm:$0xf0]  ;;  %v569_v13 = vor.u32 %v744_v7, %v566_v8  ;;  %v556_v15 = vld [vmem:[#allocation3 + $0x10] sm:$0xf]  ;;  %v743_v16 = vld [vmem:[#allocation3 + $0x14] sm:$0xf0] }
  0x19   :  { %v633_v14 = vor.u32 %v760_v11, %v630_v12  ;;  %v620_v17 = vld [vmem:[#allocation3 + $0x90] sm:$0xf]  ;;  %v557_v18 = vor.u32 %v743_v16, %v556_v15  ;;  %v759_v19 = vld [vmem:[#allocation3 + $0x94] sm:$0xf0]  ;;  %v742_v20 = vld [vmem:[#allocation3 + $0x14] sm:$0xf] }
  0x1a   :  { %328 = vmatpush.bf16.msrb.mxu0 %v585_v57  ;;  %341 = vmatpush.bf16.msrb.mxu1 %v649_v58  ;;  %v558_v21 = vld [vmem:[#allocation3 + $0x18] sm:$0xf0]  ;;  %v621_v22 = vor.u32 %v759_v19, %v620_v17  ;;  %v758_v24 = vld [vmem:[#allocation3 + $0x94] sm:$0xf]  ;;  %v548_v27 = vld [vmem:[#allocation3] sm:$0xf] }
  0x1b   :  { %303 = vmatpush.bf16.msra.mxu2 %v573_v62  ;;  %v561_v23 = vor.u32 %v742_v20, %v558_v21  ;;  %v622_v25 = vld [vmem:[#allocation3 + $0x98] sm:$0xf0]  ;;  %v741_v28 = vld [vmem:[#allocation3 + $0x4] sm:$0xf0]  ;;  %v612_v29 = vld [vmem:[#allocation3 + $0x80] sm:$0xf] }
  0x1c   :  { %316 = vmatpush.bf16.msra.mxu3 %v637_v63  ;;  %v625_v26 = vor.u32 %v758_v24, %v622_v25  ;;  %v549_v30 = vor.u32 %v741_v28, %v548_v27  ;;  %v757_v31 = vld [vmem:[#allocation3 + $0x84] sm:$0xf0]  ;;  %v740_v32 = vld [vmem:[#allocation3 + $0x4] sm:$0xf]  ;;  %v550_v33 = vld [vmem:[#allocation3 + $0x8] sm:$0xf0] }
  0x1d   :  { %v613_v34 = vor.u32 %v757_v31, %v612_v29  ;;  %v553_v35 = vor.u32 %v740_v32, %v550_v33  ;;  %v756_v36 = vld [vmem:[#allocation3 + $0x84] sm:$0xf]  ;;  %v614_v37 = vld [vmem:[#allocation3 + $0x88] sm:$0xf0]  ;;  %v787_v39 = vld [vmem:[%s985_s6 + $0x78] sm:$0xff]  ;;  %s524_s10 = sshll.u32 %s850_s9, 4  ;;  %s525_s10 = int_to_ptr.vmem [resolvable:$true] %s524_s10 }
  0x1e   :  { %329 = vmatpush.bf16.msrb.mxu0 %v577_v5  ;;  %342 = vmatpush.bf16.msrb.mxu1 %v641_v6  ;;  %v617_v38 = vor.u32 %v756_v36, %v614_v37  ;;  %v779_v40 = vld [vmem:[%s985_s6 + $0x38] sm:$0xff]  ;;  %v786_v41 = vld [vmem:[%s985_s6 + $0x70] sm:$0xff]  ;;  %v785_v43 = vld [vmem:[%s985_s6 + $0x68] sm:$0xff]  ;;  %s526_s13 = sshll.u32 %s987_s8, 4  ;;  %vm517_vm1 = vcmask 58368   ;;  %s527_s13 = int_to_ptr.hbm [resolvable:$true] %s526_s13 }
  0x1f   :  { %304 = vmatpush.bf16.msra.mxu2 %v565_v9  ;;  %v778_v42 = vld [vmem:[%s985_s6 + $0x30] sm:$0xff]  ;;  %v777_v44 = vld [vmem:[%s985_s6 + $0x28] sm:$0xff]  ;;  %v784_v45 = vld [vmem:[%s985_s6 + $0x60] sm:$0xff] }
  0x20   :  { %317 = vmatpush.bf16.msra.mxu3 %v629_v10  ;;  %v776_v46 = vld [vmem:[%s985_s6 + $0x20] sm:$0xff]  ;;  %v783_v47 = vld [vmem:[%s985_s6 + $0x58] sm:$0xff]  ;;  %v782_v49 = vld [vmem:[%s985_s6 + $0x50] sm:$0xff] }
  0x21   :  { %v51_v48 = vld [vmem:[%s982_s3] sm:$0x3]  ;;  %v775_v62 = vld [vmem:[%s985_s6 + $0x18] sm:$0xff]  ;;  %v781_v63 = vld [vmem:[%s985_s6 + $0x48] sm:$0xff] }
  0x22   :  { %330 = vmatpush.bf16.msrb.mxu0 %v569_v13  ;;  %343 = vmatpush.bf16.msrb.mxu1 %v633_v14  ;;  %v53_v50 = vperm.slane %v51_v48, 0  ;;  %v54_v51 = vperm.slane %v51_v48, 1  ;;  %v774_v0 = vld [vmem:[%s985_s6 + $0x10] sm:$0xff]  ;;  %v780_v1 = vld [vmem:[%s985_s6 + $0x40] sm:$0xff]  ;;  %v773_v2 = vld [vmem:[%s985_s6 + $0x8] sm:$0xff] }
  0x23   :  { %305 = vmatpush.bf16.msra.mxu2 %v557_v18  ;;  %v772_v3 = vld [vmem:[%s985_s6] sm:$0xff] }
  0x24   :  { %318 = vmatpush.bf16.msra.mxu3 %v621_v22  ;;  %v133_v4 = vld [vmem:[%s984_s5] sm:$0x3] }
  0x25   :  { %v136_v5 = vperm.slane %v133_v4, 1  ;;  %v135_v10 = vperm.slane %v133_v4, 0  ;;  %v792_v24 = vld [vmem:[%s986_s7] ss:$0 sm:$0xff] }
  0x26   :  { %331 = vmatpush.bf16.msrb.mxu0 %v561_v23  ;;  %344 = vmatpush.bf16.msrb.mxu1 %v625_v26 }
  0x27   :  { %306 = vmatpush.bf16.msra.mxu2 %v549_v30  ;;  %v515_v30 = vstv %s979_s0 }
  0x28   :  { %319 = vmatpush.bf16.msra.mxu3 %v613_v34 }
  0x2a   :  { %332 = vmatpush.bf16.msrb.mxu0 %v553_v35  ;;  %345 = vmatpush.bf16.msrb.mxu1 %v617_v38 }
  0x2b   :  { %487 = vmatpush.bf16.msrb.mxu2 %v779_v40 }
  0x2c   :  { %500 = vmatpush.bf16.msrb.mxu3 %v787_v39 }
  0x2f   :  { %488 = vmatpush.bf16.msrb.mxu2 %v778_v42 }
  0x30   :  { %501 = vmatpush.bf16.msrb.mxu3 %v786_v41 }
  0x33   :  { %489 = vmatpush.bf16.msrb.mxu2 %v777_v44 }
  0x34   :  { %502 = vmatpush.bf16.msrb.mxu3 %v785_v43 }
  0x37   :  { %490 = vmatpush.bf16.msrb.mxu2 %v776_v46 }
  0x38   :  { %503 = vmatpush.bf16.msrb.mxu3 %v784_v45 }
  0x3b   :  { %491 = vmatpush.bf16.msrb.mxu2 %v775_v62 }
  0x3c   :  { %504 = vmatpush.bf16.msrb.mxu3 %v783_v47 }
  0x3f   :  { %492 = vmatpush.bf16.msrb.mxu2 %v774_v0 }
  0x40   :  { %505 = vmatpush.bf16.msrb.mxu3 %v782_v49 }
  0x43   :  { %493 = vmatpush.bf16.msrb.mxu2 %v773_v2 }
  0x44   :  { %506 = vmatpush.bf16.msrb.mxu3 %v781_v63 }
  0x47   :  { %494 = vmatpush.bf16.msrb.mxu2 %v772_v3 }
  0x48   :  { %507 = vmatpush.bf16.msrb.mxu3 %v780_v1 }
  0x8a   :  { %v80_v52 = vpop.f32.mrf.mxu0  ;;  %v93_v54 = vpop.f32.mrf.mxu1 }
  0x8b   :  { %v81_v53 = vadd.f32 %v80_v52, %v53_v50  ;;  %v94_v55 = vadd.f32 %v93_v54, %v54_v51 }
  0x8d   :  { %v97_v56 = vmax.f32 %v81_v53, 0.0  ;;  %v98_v57 = vmax.f32 %v94_v55, 0.0 }
  0x8f   :  { %v99_v58 = vpack.c.bf16 %v97_v56, %v97_v56  ;;  %v100_v59 = vpack.c.bf16 %v98_v57, %v98_v57 }
  0x91   :  { %307 = vmatmul.bf16.vlgmr.msra.gmra.mxu2 %v99_v58  ;;  %333 = vmatmul.bf16.vlgmr.msrb.gmra.mxu0 %v99_v58 }
  0x92   :  { %320 = vmatmul.bf16.vlgmr.msra.gmra.mxu3 %v100_v59  ;;  %346 = vmatmul.bf16.vlgmr.msrb.gmra.mxu1 %v100_v59  ;;  %v82_v60 = vpop.f32.mrf.mxu0  ;;  %v95_v61 = vpop.f32.mrf.mxu1 }
 0x10e   :  { %v334_v6 = vpop.f32.mrf.mxu0 }
 0x10f   :  { %v335_v7 = vadd.f32 %v334_v6, %v136_v5  ;;  %v347_v8 = vpop.f32.mrf.mxu1 }
 0x111   :  { %v348_v9 = vadd.f32 %v347_v8, %v335_v7 }
 0x113   :  { %v352_v11 = vmax.f32 %v348_v9, 0.0 }
 0x114   :  { %v308_v12 = vpop.f32.mrf.mxu2 }
 0x115   :  { %v354_v13 = vpack.c.bf16 %v352_v11, %v352_v11  ;;  %v309_v14 = vadd.f32 %v308_v12, %v135_v10  ;;  %v321_v15 = vpop.f32.mrf.mxu3 }
 0x116   :  { %v336_v16 = vpop.f32.mrf.mxu0 }
 0x117   :  { %v322_v17 = vadd.f32 %v321_v15, %v309_v14  ;;  %v349_v18 = vpop.f32.mrf.mxu1  ;;  %508 = vmatmul.bf16.vlgmr.msrb.gmra.mxu3 %v354_v13 }
 0x119   :  { %v351_v19 = vmax.f32 %v322_v17, 0.0 }
 0x11b   :  { %v353_v20 = vpack.c.bf16 %v351_v19, %v351_v19 }
 0x11c   :  { %v310_v21 = vpop.f32.mrf.mxu2 }
 0x11d   :  { %v323_v22 = vpop.f32.mrf.mxu3  ;;  %495 = vmatmul.bf16.vlgmr.msrb.gmra.mxu2 %v353_v20 }
 0x19a   :  { %v509_v23 = vpop.f32.mrf.mxu3 }
 0x1a0   :  { %v496_v25 = vpop.f32.mrf.mxu2 }
 0x1a1   :  { %v497_v26 = vadd.f32 %v792_v24, %v496_v25 }
 0x1a2   :  { %v511_v27 = vpop.f32.mrf.mxu3 }
 0x1a3   :  { %v510_v28 = vadd.f32 %v509_v23, %v497_v26 }
 0x1a5   :  { %793 = vtanh.f32 %v510_v28 }
 0x1a8   :  { %v498_v29 = vpop.f32.mrf.mxu2 }
 0x1ab   :  { %v794_v31 = vpop.eup %793 }
 0x1ac   :  { %v516_v32 = vmul.f32 %v794_v31, %v515_v30 }
 0x1ae   :  { %518 = vst.msk [vmem:[#allocation6] sm:$0x3] %vm517_vm1, %v516_v32 }
 0x1af   :  { %529 = dma.vmem_to_hbm [thread:$0]  %s525_s10, 32, %s527_s13, [#allocation5]  }
 0x1b0   :  { %845 = dma.done.wait [#allocation5], 32  }
 0x1b1   :  { %846 = vsyncadd [#allocation5], 4294967264 }
 0x1b2   :  { %534 = vsyncpa [#allocation4], 1 }
 0x1b3   :  { %535 = vsyncpa [#allocation5], 1 }

</bundles_post_ra>
